<compile_context>
chip_gen: v7x
topology: tpu7x:2x2x1
jax: 0.10.0
libtpu: 0.0.40
codegen_flags: <defaults>
</compile_context>

<pallas_src>
import functools

import numpy as np
import jax
import jax.numpy as jnp
from jax import lax
from jax.experimental import pallas as pl
from jax.experimental.pallas import tpu as pltpu


def _round_up(x, m):
    return (x + m - 1) // m * m


# ----------------------------------------------------------------------------
# Kernel 1: fused Q/K/V projections, tiled over node rows.
#   - 1/sqrt(dim_q) folded into Q.
#   - bf16 outputs (storage dtype), f32 MXU accumulation.
#   - padded V rows zeroed so the attention closed-form path can sum whole
#     V tiles (padded rows would otherwise equal the V bias).
# ----------------------------------------------------------------------------
def _proj_kernel(xq_ref, xk_ref, xv_ref,
                 wq_ref, bq_ref, wk_ref, bk_ref, wv_ref, bv_ref,
                 q_out, k_out, v_out, *, tn, n_valid, q_scale):
    q = jnp.dot(xq_ref[...], wq_ref[...],
                preferred_element_type=jnp.float32) + bq_ref[...]
    k = jnp.dot(xk_ref[...], wk_ref[...],
                preferred_element_type=jnp.float32) + bk_ref[...]
    v = jnp.dot(xv_ref[...], wv_ref[...],
                preferred_element_type=jnp.float32) + bv_ref[...]
    q_out[...] = (q * q_scale).astype(q_out.dtype)
    k_out[...] = k.astype(k_out.dtype)
    row = pl.program_id(0) * tn + lax.broadcasted_iota(jnp.int32, v.shape, 0)
    v_out[...] = jnp.where(row < n_valid, v, 0.0).astype(v_out.dtype)


# ----------------------------------------------------------------------------
# Kernel 2: flash-style attention with multiplicative graph masking and
#           cross-graph tile skipping.
# ----------------------------------------------------------------------------
def _flash_attn_kernel(jlo_ref, jhi_ref,                       # scalar prefetch
                       q_ref, k_ref, v_ref, bc_ref, gr_ref, gc_ref,
                       o_ref, m_sc, l_sc, acc_sc,
                       *, tk, n_valid, kv_resident):
    i = pl.program_id(0)
    j = pl.program_id(1)

    @pl.when(j == 0)
    def _init():
        m_sc[...] = jnp.full_like(m_sc, -1e30)
        l_sc[...] = jnp.zeros_like(l_sc)
        acc_sc[...] = jnp.zeros_like(acc_sc)

    def kv_slice(ref):
        if kv_resident:
            row0 = pl.multiple_of(j * tk, tk)
            return ref[pl.ds(row0, tk), :]
        return ref[...]

    overlap = jnp.logical_and(j >= jlo_ref[i], j <= jhi_ref[i])

    @pl.when(overlap)
    def _compute_tile():
        k_tile = kv_slice(k_ref)
        v_tile = kv_slice(v_ref)
        # q @ k^T contracting the feature dim natively (bf16 in, f32 acc).
        s = lax.dot_general(q_ref[...], k_tile, (((1,), (1,)), ((), ())),
                            preferred_element_type=jnp.float32)
        # (s + b + c) * mask with bc pre-masked on host -> masked entries = 0
        # (exact PyTorch semantics; they still enter the softmax as exp(0)).
        # Padding columns carry bc = -1e30 and are fully excluded.
        same_graph = gr_ref[...] == gc_ref[...]
        a = jnp.where(same_graph, s, 0.0) + bc_ref[...].astype(jnp.float32)

        m_prev = m_sc[...]
        m_new = jnp.maximum(m_prev, jnp.max(a, axis=-1, keepdims=True))
        alpha = jnp.exp(m_prev - m_new)
        p = jnp.exp(a - m_new)
        l_sc[...] = alpha * l_sc[...] + jnp.sum(p, axis=-1, keepdims=True)
        acc_sc[...] = alpha * acc_sc[...] + jnp.dot(
            p.astype(v_tile.dtype), v_tile, preferred_element_type=jnp.float32)
        m_sc[...] = m_new

    @pl.when(jnp.logical_not(overlap))
    def _masked_tile():
        # Whole tile is cross-graph: every valid column has logit 0 and
        # contributes exp(0 - m); add the exact closed form without touching
        # the MXU, the exp of a full tile, or the bias block (its index_map
        # is clamped into [jlo, jhi], so no new DMA was issued either).
        v_tile = kv_slice(v_ref)
        n_cols = jnp.clip(n_valid - j * tk, 0, tk).astype(jnp.float32)
        m_prev = m_sc[...]
        m_new = jnp.maximum(m_prev, 0.0)
        alpha = jnp.exp(m_prev - m_new)
        e0 = jnp.exp(-m_new)                                   # (tq, 1)
        v_sum = jnp.sum(v_tile.astype(jnp.float32), axis=0, keepdims=True)
        l_sc[...] = alpha * l_sc[...] + n_cols * e0
        acc_sc[...] = alpha * acc_sc[...] + e0 * v_sum
        m_sc[...] = m_new

    @pl.when(j == pl.num_programs(1) - 1)
    def _finalize():
        o_ref[...] = (acc_sc[...] *
                      pl.reciprocal(l_sc[...], approx=False)).astype(o_ref.dtype)


# ----------------------------------------------------------------------------
# Wrapper: padding, graph ids, tile-range prefetch tables, the two
#          pallas_calls, final slice.
# ----------------------------------------------------------------------------
def graphormer_attention_head(query, key, value,
                              wq, bq, wk, bk, wv, bv,
                              b, c, ptr, *, block=256):
    # TODO(synk): a real multi-head module should pack heads into the 128-lane
    #             dimension instead of zero-padding a single head to 128.
    N, dim_in = query.shape
    dim_q = wq.shape[1]
    dim_k = wk.shape[1]
    dpad = _round_up(max(dim_q, dim_k), 128)         # lane-dense head dim
    tile = min(block, _round_up(N, 128))             # don't over-pad tiny N
    n_pad = _round_up(N, tile)
    tq = tk = tile
    num_q_tiles = n_pad // tq
    num_kv_tiles = n_pad // tk
    store_dtype = jnp.bfloat16                       # storage / DMA dtype

    # Per-node graph ids from ptr (O(N) instead of streaming an N^2 mask).
    ptr = [int(p) for p in ptr]
    gid_np = np.full((n_pad,), -1, np.int32)
    for g in range(len(ptr) - 1):
        gid_np[ptr[g]:ptr[g + 1]] = g
    gid = jnp.asarray(gid_np)
    gid_row = gid.reshape(n_pad, 1)
    gid_col = gid.reshape(1, n_pad)

    # Per-query-tile kv-tile range [jlo, jhi] covering all same-graph columns
    # (block-diagonal structure); kv tiles outside it are fully cross-graph.
    jlo_np = np.zeros((num_q_tiles,), np.int32)
    jhi_np = np.zeros((num_q_tiles,), np.int32)
    for t in range(num_q_tiles):
        r0 = t * tq
        r1 = min(r0 + tq, N)
        if r0 >= N:                                  # fully padded query tile
            continue
        g_min = int(gid_np[r0])
        g_max = int(gid_np[r1 - 1])
        jlo_np[t] = ptr[g_min] // tk
        jhi_np[t] = (ptr[g_max + 1] - 1) // tk
    jlo = jnp.asarray(jlo_np)
    jhi = jnp.asarray(jhi_np)

    def pad2(x, rows, cols):
        return jnp.pad(x, ((0, rows - x.shape[0]), (0, cols - x.shape[1])))

    qx = pad2(query, n_pad, dim_in)
    kx = pad2(key, n_pad, dim_in)
    vx = pad2(value, n_pad, dim_in)
    wqp, wkp, wvp = (pad2(w, dim_in, dpad) for w in (wq, wk, wv))
    bqp, bkp, bvp = (pad2(x, 1, dpad) for x in (bq, bk, bv))

    # Fused, pre-masked bias: bc = (b + c) * batch_mask.  Padding columns get
    # -1e30 (excluded from the softmax); stored bf16.
    mask = (gid[:N, None] == gid[None, :N]).astype(jnp.float32)
    bc = jnp.zeros((n_pad, n_pad), jnp.float32).at[:N, :N].set((b + c) * mask)
    col_valid = (jnp.arange(n_pad) < N)[None, :]
    bc = jnp.where(col_valid, bc, -1e30).astype(store_dtype)

    # ---- fused Q/K/V projections ----------------------------------------
    hi = min(n_pad, max(1024, tile))
    tn = max(d for d in range(tile, hi + 1, tile) if n_pad % d == 0)
    x_spec = pl.BlockSpec((tn, dim_in), lambda i: (i, 0))
    w_spec = pl.BlockSpec((dim_in, dpad), lambda i: (0, 0))     # resident
    bias_spec = pl.BlockSpec((1, dpad), lambda i: (0, 0))
    qkv_out_spec = pl.BlockSpec((tn, dpad), lambda i: (i, 0))

    proj = functools.partial(_proj_kernel, tn=tn, n_valid=N,
                             q_scale=1.0 / float(dim_q) ** 0.5)
    qp, kp, vp = pl.pallas_call(
        proj,
        out_shape=[jax.ShapeDtypeStruct((n_pad, dpad), store_dtype)] * 3,
        grid=(n_pad // tn,),
        in_specs=[x_spec, x_spec, x_spec,
                  w_spec, bias_spec, w_spec, bias_spec, w_spec, bias_spec],
        out_specs=[qkv_out_spec] * 3,
        compiler_params=pltpu.CompilerParams(
            dimension_semantics=("parallel",)),
    )(qx, kx, vx, wqp, bqp, wkp, bkp, wvp, bvp)

    # ---- flash attention --------------------------------------------------
    # K/V whole-array residency (DMA'd once) when it fits a v7x-safe budget
    # (double-buffered bf16 copies under ~24 MiB); otherwise per-tile fetch.
    kv_resident = (2 * 2 * n_pad * dpad * 2) <= 24 * 1024 * 1024
    if kv_resident:
        k_spec = pl.BlockSpec((n_pad, dpad), lambda i, j, *_: (0, 0))
        v_spec = pl.BlockSpec((n_pad, dpad), lambda i, j, *_: (0, 0))
    else:
        k_spec = pl.BlockSpec((tk, dpad), lambda i, j, *_: (j, 0))
        v_spec = pl.BlockSpec((tk, dpad), lambda i, j, *_: (j, 0))

    def bc_index_map(i, j, jlo_ref, jhi_ref):
        # Clamp into the overlapping range: skipped (cross-graph) steps reuse
        # an already-loaded block, so no bias DMA is issued for them.
        return (i, jnp.minimum(jnp.maximum(j, jlo_ref[i]), jhi_ref[i]))

    kernel = functools.partial(_flash_attn_kernel, tk=tk, n_valid=N,
                               kv_resident=kv_resident)

    flops = int(4 * n_pad * n_pad * dpad)
    bytes_accessed = int(2 * n_pad * n_pad + 2 * 3 * n_pad * dpad
                         + 4 * n_pad * dpad + 8 * n_pad)

    out = pl.pallas_call(
        kernel,
        out_shape=jax.ShapeDtypeStruct((n_pad, dpad), jnp.float32),
        grid_spec=pltpu.PrefetchScalarGridSpec(
            num_scalar_prefetch=2,
            grid=(num_q_tiles, num_kv_tiles),
            in_specs=[
                pl.BlockSpec((tq, dpad), lambda i, j, *_: (i, 0)),  # Q tile
                k_spec,                                             # K
                v_spec,                                             # V
                pl.BlockSpec((tq, tk), bc_index_map),               # fused bias
                pl.BlockSpec((tq, 1), lambda i, j, *_: (i, 0)),     # gid rows
                pl.BlockSpec((1, tk), lambda i, j, *_: (0, j)),     # gid cols
            ],
            out_specs=pl.BlockSpec((tq, dpad), lambda i, j, *_: (i, 0)),
            scratch_shapes=[pltpu.VMEM((tq, 1), jnp.float32),       # m
                            pltpu.VMEM((tq, 1), jnp.float32),       # l
                            pltpu.VMEM((tq, dpad), jnp.float32)]),  # acc
        compiler_params=pltpu.CompilerParams(
            dimension_semantics=("parallel", "arbitrary"),
            vmem_limit_bytes=48 * 1024 * 1024),
        cost_estimate=pl.CostEstimate(flops=flops,
                                      transcendentals=int(n_pad * n_pad),
                                      bytes_accessed=bytes_accessed),
    )(jlo, jhi, qp, kp, vp, bc, gid_row, gid_col)

    return out[:N, :dim_k]


# ----------------------------------------------------------------------------
# Glue: EdgeEncoding (dict-based ragged path gather).
# TODO(synk): edge_paths is a Python dict-of-dicts with ragged lists; the
#             gather/mean is computed in plain JAX, not inside a kernel.
# ----------------------------------------------------------------------------
def edge_encoding(num_nodes, edge_attr, w_edge, edge_paths, max_len):
    scores = (edge_attr @ w_edge.T).reshape(-1)      # edge_lin (no bias)
    srcs, dsts, paths = [], [], []
    for src in edge_paths:
        for dst in edge_paths[src]:
            p = list(edge_paths[src][dst])
            srcs.append(src)
            dsts.append(dst)
            paths.append(p + [-1] * (max_len - len(p)))
    if not srcs:
        return jnp.zeros((num_nodes, num_nodes), jnp.float32)
    src_idx = jnp.asarray(srcs, jnp.int32)
    dst_idx = jnp.asarray(dsts, jnp.int32)
    path_idx = jnp.asarray(paths, jnp.int32)          # (P, max_len), -1 padded
    valid = path_idx >= 0
    gathered = jnp.where(valid, scores[jnp.clip(path_idx, 0, None)], 0.0)
    counts = valid.sum(axis=1)
    means = jnp.where(counts > 0, gathered.sum(axis=1) / jnp.maximum(counts, 1), 0.0)
    means = jnp.nan_to_num(means)                     # matches torch.nan_to_num
    cij = jnp.zeros((num_nodes, num_nodes), jnp.float32)
    cij = cij.at[src_idx, dst_idx].set(means)
    return cij


if __name__ == "__main__":
    # Small shapes consistent with the module.
    N = 8           # number of nodes in the batch of graphs
    dim_in = 32
    dim_q = 16
    dim_k = 16
    edge_dim = 8
    E = 10          # number of edges

    key0 = jax.random.PRNGKey(0)
    ks = jax.random.split(key0, 12)

    query = jax.random.normal(ks[0], (N, dim_in), jnp.float32)
    key_x = jax.random.normal(ks[1], (N, dim_in), jnp.float32)
    value = jax.random.normal(ks[2], (N, dim_in), jnp.float32)
    edge_attr = jax.random.normal(ks[3], (E, edge_dim), jnp.float32)
    b_spatial = jax.random.normal(ks[4], (N, N), jnp.float32) * 0.1

    # Synthetic PyTorch nn.Linear parameters, passed as (in, out) / (1, out).
    wq_t = jax.random.normal(ks[5], (dim_in, dim_q), jnp.float32) * 0.1
    bq = jax.random.normal(ks[6], (1, dim_q), jnp.float32) * 0.1
    wk_t = jax.random.normal(ks[7], (dim_in, dim_k), jnp.float32) * 0.1
    bk = jax.random.normal(ks[8], (1, dim_k), jnp.float32) * 0.1
    wv_t = jax.random.normal(ks[9], (dim_in, dim_k), jnp.float32) * 0.1
    bv = jax.random.normal(ks[10], (1, dim_k), jnp.float32) * 0.1
    w_edge = jax.random.normal(ks[11], (1, edge_dim), jnp.float32) * 0.1

    # Two graphs of 4 nodes each.
    ptr = [0, 4, 8]
    edge_paths = {
        0: {1: [0], 2: [0, 1], 3: [0, 1, 2]},
        1: {2: [1], 3: [1, 2]},
        2: {3: [2]},
        4: {5: [5], 6: [5, 6], 7: [5, 6, 7]},
        5: {6: [6], 7: [6, 7]},
        6: {7: [7]},
    }

    c = edge_encoding(N, edge_attr, w_edge, edge_paths, max_len=4)

    out = graphormer_attention_head(query, key_x, value,
                                    wq_t, bq, wk_t, bk, wv_t, bv,
                                    b_spatial, c, ptr)
    out = jax.block_until_ready(out)

    # Float64 numpy reference (exact PyTorch semantics).
    qn = np.asarray(query, np.float64)
    kn = np.asarray(key_x, np.float64)
    vn = np.asarray(value, np.float64)
    q_r = qn @ np.asarray(wq_t, np.float64) + np.asarray(bq, np.float64)
    k_r = kn @ np.asarray(wk_t, np.float64) + np.asarray(bk, np.float64)
    v_r = vn @ np.asarray(wv_t, np.float64) + np.asarray(bv, np.float64)
    mask = np.zeros((N, N))
    for i in range(len(ptr) - 1):
        mask[ptr[i]:ptr[i + 1], ptr[i]:ptr[i + 1]] = 1.0
    a_r = (q_r @ k_r.T) / (dim_q ** 0.5)
    a_r = (a_r + np.asarray(b_spatial, np.float64) + np.asarray(c, np.float64)) * mask
    a_r = a_r - a_r.max(axis=-1, keepdims=True)
    e_r = np.exp(a_r)
    sm_r = e_r / e_r.sum(axis=-1, keepdims=True)
    x_r = sm_r @ v_r

    # bf16 storage of Q/K/V/bias -> relaxed tolerance (math/accum stay f32).
    np.testing.assert_allclose(np.asarray(out), x_r, rtol=5e-2, atol=5e-2)
    print("KERNEL_OK")
</pallas_src>

<mosaic_0001>
module attributes {stable_mosaic.version = 11 : i64} {
  func.func @_proj_kernel(%arg0: i32, %arg1: memref<128x32xf32, #tpu.memory_space<vmem>>, %arg2: memref<128x32xf32, #tpu.memory_space<vmem>>, %arg3: memref<128x32xf32, #tpu.memory_space<vmem>>, %arg4: memref<32x128xf32, #tpu.memory_space<vmem>>, %arg5: memref<1x128xf32, #tpu.memory_space<vmem>>, %arg6: memref<32x128xf32, #tpu.memory_space<vmem>>, %arg7: memref<1x128xf32, #tpu.memory_space<vmem>>, %arg8: memref<32x128xf32, #tpu.memory_space<vmem>>, %arg9: memref<1x128xf32, #tpu.memory_space<vmem>>, %arg10: memref<128x128xbf16, #tpu.memory_space<vmem>>, %arg11: memref<128x128xbf16, #tpu.memory_space<vmem>>, %arg12: memref<128x128xbf16, #tpu.memory_space<vmem>>) attributes {dimension_semantics = [#tpu.dimension_semantics<parallel>], iteration_bounds = array<i64: 1>, scalar_prefetch = 0 : i64, scratch_operands = 0 : i64, tpu.core_type = #tpu.core_type<tc>, window_params = [{transform_indices = @transform_0, window_bounds = array<i64: 128, 32>}, {transform_indices = @transform_1, window_bounds = array<i64: 128, 32>}, {transform_indices = @transform_2, window_bounds = array<i64: 128, 32>}, {pipeline_mode = #tpu.pipeline_mode<synchronous>, transform_indices = @transform_3, window_bounds = array<i64: 32, 128>}, {pipeline_mode = #tpu.pipeline_mode<synchronous>, transform_indices = @transform_4, window_bounds = array<i64: 1, 128>}, {pipeline_mode = #tpu.pipeline_mode<synchronous>, transform_indices = @transform_5, window_bounds = array<i64: 32, 128>}, {pipeline_mode = #tpu.pipeline_mode<synchronous>, transform_indices = @transform_6, window_bounds = array<i64: 1, 128>}, {pipeline_mode = #tpu.pipeline_mode<synchronous>, transform_indices = @transform_7, window_bounds = array<i64: 32, 128>}, {pipeline_mode = #tpu.pipeline_mode<synchronous>, transform_indices = @transform_8, window_bounds = array<i64: 1, 128>}, {transform_indices = @transform_9, window_bounds = array<i64: 128, 128>}, {transform_indices = @transform_10, window_bounds = array<i64: 128, 128>}, {transform_indices = @transform_11, window_bounds = array<i64: 128, 128>}]} {
    %c0 = arith.constant 0 : index
    %c0_0 = arith.constant 0 : index
    %0 = vector.load %arg1[%c0, %c0_0] : memref<128x32xf32, #tpu.memory_space<vmem>>, vector<128x32xf32>
    %c0_1 = arith.constant 0 : index
    %c0_2 = arith.constant 0 : index
    %1 = vector.load %arg4[%c0_1, %c0_2] : memref<32x128xf32, #tpu.memory_space<vmem>>, vector<32x128xf32>
    %cst = arith.constant dense<0.000000e+00> : vector<128x128xf32>
    %2 = tpu.matmul %0, %1, %cst {dimension_numbers = #tpu.dot_dimension_numbers<[1], [0], [0], [1], [0, 0, 1, 1], [], []>} : vector<128x32xf32>, vector<32x128xf32>, vector<128x128xf32> -> vector<128x128xf32>
    %c0_3 = arith.constant 0 : index
    %c0_4 = arith.constant 0 : index
    %3 = vector.load %arg5[%c0_3, %c0_4] : memref<1x128xf32, #tpu.memory_space<vmem>>, vector<1x128xf32>
    %4 = vector.broadcast %3 : vector<1x128xf32> to vector<128x128xf32>
    %5 = arith.addf %2, %4 : vector<128x128xf32>
    %c0_5 = arith.constant 0 : index
    %c0_6 = arith.constant 0 : index
    %6 = vector.load %arg2[%c0_5, %c0_6] : memref<128x32xf32, #tpu.memory_space<vmem>>, vector<128x32xf32>
    %c0_7 = arith.constant 0 : index
    %c0_8 = arith.constant 0 : index
    %7 = vector.load %arg6[%c0_7, %c0_8] : memref<32x128xf32, #tpu.memory_space<vmem>>, vector<32x128xf32>
    %cst_9 = arith.constant dense<0.000000e+00> : vector<128x128xf32>
    %8 = tpu.matmul %6, %7, %cst_9 {dimension_numbers = #tpu.dot_dimension_numbers<[1], [0], [0], [1], [0, 0, 1, 1], [], []>} : vector<128x32xf32>, vector<32x128xf32>, vector<128x128xf32> -> vector<128x128xf32>
    %c0_10 = arith.constant 0 : index
    %c0_11 = arith.constant 0 : index
    %9 = vector.load %arg7[%c0_10, %c0_11] : memref<1x128xf32, #tpu.memory_space<vmem>>, vector<1x128xf32>
    %10 = vector.broadcast %9 : vector<1x128xf32> to vector<128x128xf32>
    %11 = arith.addf %8, %10 : vector<128x128xf32>
    %c0_12 = arith.constant 0 : index
    %c0_13 = arith.constant 0 : index
    %12 = vector.load %arg3[%c0_12, %c0_13] : memref<128x32xf32, #tpu.memory_space<vmem>>, vector<128x32xf32>
    %c0_14 = arith.constant 0 : index
    %c0_15 = arith.constant 0 : index
    %13 = vector.load %arg8[%c0_14, %c0_15] : memref<32x128xf32, #tpu.memory_space<vmem>>, vector<32x128xf32>
    %cst_16 = arith.constant dense<0.000000e+00> : vector<128x128xf32>
    %14 = tpu.matmul %12, %13, %cst_16 {dimension_numbers = #tpu.dot_dimension_numbers<[1], [0], [0], [1], [0, 0, 1, 1], [], []>} : vector<128x32xf32>, vector<32x128xf32>, vector<128x128xf32> -> vector<128x128xf32>
    %c0_17 = arith.constant 0 : index
    %c0_18 = arith.constant 0 : index
    %15 = vector.load %arg9[%c0_17, %c0_18] : memref<1x128xf32, #tpu.memory_space<vmem>>, vector<1x128xf32>
    %16 = vector.broadcast %15 : vector<1x128xf32> to vector<128x128xf32>
    %17 = arith.addf %14, %16 : vector<128x128xf32>
    %cst_19 = arith.constant 2.500000e-01 : f32
    %18 = vector.broadcast %cst_19 : f32 to vector<128x128xf32>
    %19 = arith.mulf %5, %18 : vector<128x128xf32>
    %20 = arith.truncf %19 : vector<128x128xf32> to vector<128x128xbf16>
    %c0_20 = arith.constant 0 : index
    %c0_21 = arith.constant 0 : index
    %21 = vector.load %arg10[%c0_20, %c0_21] : memref<128x128xbf16, #tpu.memory_space<vmem>>, vector<128x128xbf16>
    tpu.vector_store %arg10[%c0_20, %c0_21], %20 {strides = array<i32>} : memref<128x128xbf16, #tpu.memory_space<vmem>>, vector<128x128xbf16>,
    %22 = arith.truncf %11 : vector<128x128xf32> to vector<128x128xbf16>
    %c0_22 = arith.constant 0 : index
    %c0_23 = arith.constant 0 : index
    %23 = vector.load %arg11[%c0_22, %c0_23] : memref<128x128xbf16, #tpu.memory_space<vmem>>, vector<128x128xbf16>
    tpu.vector_store %arg11[%c0_22, %c0_23], %22 {strides = array<i32>} : memref<128x128xbf16, #tpu.memory_space<vmem>>, vector<128x128xbf16>,
    %c128_i32 = arith.constant 128 : i32
    %24 = arith.muli %arg0, %c128_i32 : i32
    %25 = tpu.iota {dimensions = array<i32: 0>} : vector<128x128xi32>
    %26 = vector.broadcast %24 : i32 to vector<128x128xi32>
    %27 = arith.addi %26, %25 : vector<128x128xi32>
    %c8_i32 = arith.constant 8 : i32
    %28 = vector.broadcast %c8_i32 : i32 to vector<128x128xi32>
    %29 = arith.cmpi slt, %27, %28 : vector<128x128xi32>
    %cst_24 = arith.constant 0.000000e+00 : f32
    %30 = vector.broadcast %cst_24 : f32 to vector<128x128xf32>
    %31 = arith.select %29, %17, %30 : vector<128x128xi1>, vector<128x128xf32>
    %32 = arith.truncf %31 : vector<128x128xf32> to vector<128x128xbf16>
    %c0_25 = arith.constant 0 : index
    %c0_26 = arith.constant 0 : index
    %33 = vector.load %arg12[%c0_25, %c0_26] : memref<128x128xbf16, #tpu.memory_space<vmem>>, vector<128x128xbf16>
    tpu.vector_store %arg12[%c0_25, %c0_26], %32 {strides = array<i32>} : memref<128x128xbf16, #tpu.memory_space<vmem>>, vector<128x128xbf16>,
    return
  }
  func.func @transform_0(%arg0: i32) -> (i32, i32) {
    %c0_i32 = arith.constant 0 : i32
    %c0_i32_0 = arith.constant 0 : i32
    return %arg0, %c0_i32 : i32, i32
  }
  func.func @transform_1(%arg0: i32) -> (i32, i32) {
    %c0_i32 = arith.constant 0 : i32
    %c0_i32_0 = arith.constant 0 : i32
    return %arg0, %c0_i32 : i32, i32
  }
  func.func @transform_2(%arg0: i32) -> (i32, i32) {
    %c0_i32 = arith.constant 0 : i32
    %c0_i32_0 = arith.constant 0 : i32
    return %arg0, %c0_i32 : i32, i32
  }
  func.func @transform_3(%arg0: i32) -> (i32, i32) {
    %c0_i32 = arith.constant 0 : i32
    %c0_i32_0 = arith.constant 0 : i32
    %c0_i32_1 = arith.constant 0 : i32
    return %c0_i32, %c0_i32_0 : i32, i32
  }
  func.func @transform_4(%arg0: i32) -> (i32, i32) {
    %c0_i32 = arith.constant 0 : i32
    %c0_i32_0 = arith.constant 0 : i32
    %c0_i32_1 = arith.constant 0 : i32
    return %c0_i32, %c0_i32_0 : i32, i32
  }
  func.func @transform_5(%arg0: i32) -> (i32, i32) {
    %c0_i32 = arith.constant 0 : i32
    %c0_i32_0 = arith.constant 0 : i32
    %c0_i32_1 = arith.constant 0 : i32
    return %c0_i32, %c0_i32_0 : i32, i32
  }
  func.func @transform_6(%arg0: i32) -> (i32, i32) {
    %c0_i32 = arith.constant 0 : i32
    %c0_i32_0 = arith.constant 0 : i32
    %c0_i32_1 = arith.constant 0 : i32
    return %c0_i32, %c0_i32_0 : i32, i32
  }
  func.func @transform_7(%arg0: i32) -> (i32, i32) {
    %c0_i32 = arith.constant 0 : i32
    %c0_i32_0 = arith.constant 0 : i32
    %c0_i32_1 = arith.constant 0 : i32
    return %c0_i32, %c0_i32_0 : i32, i32
  }
  func.func @transform_8(%arg0: i32) -> (i32, i32) {
    %c0_i32 = arith.constant 0 : i32
    %c0_i32_0 = arith.constant 0 : i32
    %c0_i32_1 = arith.constant 0 : i32
    return %c0_i32, %c0_i32_0 : i32, i32
  }
  func.func @transform_9(%arg0: i32) -> (i32, i32) {
    %c0_i32 = arith.constant 0 : i32
    %c0_i32_0 = arith.constant 0 : i32
    return %arg0, %c0_i32 : i32, i32
  }
  func.func @transform_10(%arg0: i32) -> (i32, i32) {
    %c0_i32 = arith.constant 0 : i32
    %c0_i32_0 = arith.constant 0 : i32
    return %arg0, %c0_i32 : i32, i32
  }
  func.func @transform_11(%arg0: i32) -> (i32, i32) {
    %c0_i32 = arith.constant 0 : i32
    %c0_i32_0 = arith.constant 0 : i32
    return %arg0, %c0_i32 : i32, i32
  }
}

</mosaic_0001>

<bundles_post_ra>
// kernel: tpu_custom_call.1
= control target key start
LH: loop header
LB: loop body
LE: loop exit
PB: predicated region body
PF: predicated region fallthrough
CT: control target
= control target key end

     0   :  { %17 = vsyncpa [#allocation3], 0  ;;  %vm64_vm0 = vcmask 261120   ;;  %s1934_s0 = inlined_call_operand.vmem [shape: f32[128,32], index: 0, kind: input, shape index: {}]   ;;  %s1935_s1 = inlined_call_operand.vmem [shape: f32[128,32], index: 1, kind: input, shape index: {}]   ;;  %s1936_s2 = inlined_call_operand.vmem [shape: f32[128,32], index: 2, kind: input, shape index: {}]   ;;  %s1937_s3 = inlined_call_operand.vmem [shape: f32[32,128], index: 3, kind: input, shape index: {}]   ;;  %s1938_s4 = inlined_call_operand.vmem [shape: f32[1,128], index: 4, kind: input, shape index: {}]   ;;  %s1939_s5 = inlined_call_operand.vmem [shape: f32[32,128], index: 5, kind: input, shape index: {}]   ;;  %s1940_s6 = inlined_call_operand.vmem [shape: f32[1,128], index: 6, kind: input, shape index: {}]   ;;  %s1941_s7 = inlined_call_operand.vmem [shape: f32[32,128], index: 7, kind: input, shape index: {}]   ;;  %s1942_s8 = inlined_call_operand.vmem [shape: f32[1,128], index: 8, kind: input, shape index: {}]   ;;  %s1943_s9 = inlined_call_operand.hbm [shape: bf16[128,128], index: 9, kind: output, shape index: {0}]   ;;  %s1944_s10 = inlined_call_operand.hbm [shape: bf16[128,128], index: 10, kind: output, shape index: {1}]   ;;  %s1945_s11 = inlined_call_operand.hbm [shape: bf16[128,128], index: 11, kind: output, shape index: {2}]  }
   0x1   :  { %v53_v0 = vld [vmem:[%s1937_s3] sm:$0xff]  ;;  %v54_v1 = vld [vmem:[%s1937_s3 + $0x8] sm:$0xff]  ;;  %v55_v2 = vld [vmem:[%s1937_s3 + $0x10] sm:$0xff] }
   0x2   :  { %v1455_v3 = vpack.c.bf16 %v54_v1, %v53_v0  ;;  %v56_v4 = vld [vmem:[%s1937_s3 + $0x18] sm:$0xff]  ;;  %v45_v5 = vld [vmem:[%s1934_s0 + $0x40] sm:$0xff]  ;;  %v275_v8 = vld [vmem:[%s1939_s5 + $0x8] sm:$0xff] }
   0x3   :  { %v1459_v6 = vpack.c.bf16 %v56_v4, %v55_v2  ;;  %1379 = vmatprep.mubr.msk.f32.mxu1 %vm64_vm0, %v45_v5  ;;  %v274_v7 = vld [vmem:[%s1939_s5] sm:$0xff]  ;;  %v495_v11 = vld [vmem:[%s1941_s7 + $0x8] sm:$0xff]  ;;  %v276_v14 = vld [vmem:[%s1939_s5 + $0x10] sm:$0xff] }
   0x4   :  { %1479 = vmatprep.subr.bf16.mxu1 %v1455_v3  ;;  %1456 = vmatprep.subr.bf16.mxu0 %v1455_v3  ;;  %v37_v9 = vld [vmem:[%s1934_s0] sm:$0xff]  ;;  %v1463_v12 = vpack.c.bf16 %v275_v8, %v274_v7  ;;  %v277_v15 = vld [vmem:[%s1939_s5 + $0x18] sm:$0xff]  ;;  %v46_v16 = vld [vmem:[%s1934_s0 + $0x48] sm:$0xff] }
   0x5   :  { %1481 = vmatpush3.bf16.msra.mxu1 %v1455_v3  ;;  %1458 = vmatpush3.bf16.msra.mxu0 %v1455_v3  ;;  %v494_v10 = vld [vmem:[%s1941_s7] sm:$0xff]  ;;  %v38_v17 = vld [vmem:[%s1934_s0 + $0x8] sm:$0xff]  ;;  %v496_v18 = vld [vmem:[%s1941_s7 + $0x10] sm:$0xff]  ;;  %v1467_v21 = vpack.c.bf16 %v277_v15, %v276_v14 }
   0x6   :  { %1480 = vmatprep.subr.bf16.mxu1 %v1459_v6  ;;  %1460 = vmatprep.subr.bf16.mxu0 %v1459_v6  ;;  %v1471_v13 = vpack.c.bf16 %v495_v11, %v494_v10  ;;  %v497_v19 = vld [vmem:[%s1941_s7 + $0x18] sm:$0xff]  ;;  %v47_v20 = vld [vmem:[%s1934_s0 + $0x50] sm:$0xff]  ;;  %v49_v26 = vld [vmem:[%s1934_s0 + $0x60] sm:$0xff] }
   0x7   :  { %1367 = vmatprep.mubr.msk.f32.mxu0 %vm64_vm0, %v37_v9  ;;  %v1475_v22 = vpack.c.bf16 %v497_v19, %v496_v18  ;;  %v39_v23 = vld [vmem:[%s1934_s0 + $0x10] sm:$0xff]  ;;  %v48_v24 = vld [vmem:[%s1934_s0 + $0x58] sm:$0xff]  ;;  %v41_v27 = vld [vmem:[%s1934_s0 + $0x20] sm:$0xff] }
   0x8   :  { %v40_v25 = vld [vmem:[%s1934_s0 + $0x18] sm:$0xff]  ;;  %v50_v28 = vld [vmem:[%s1934_s0 + $0x68] sm:$0xff]  ;;  %v51_v30 = vld [vmem:[%s1934_s0 + $0x70] sm:$0xff] }
   0x9   :  { %1482 = vmatpush3.bf16.msra.mxu1 %v1459_v6  ;;  %1462 = vmatpush3.bf16.msra.mxu0 %v1459_v6  ;;  %v42_v29 = vld [vmem:[%s1934_s0 + $0x28] sm:$0xff]  ;;  %v43_v31 = vld [vmem:[%s1934_s0 + $0x30] sm:$0xff]  ;;  %v52_v32 = vld [vmem:[%s1934_s0 + $0x78] sm:$0xff] }
   0xa   :  { %1464 = vmatprep.subr.bf16.mxu1 %v1463_v12  ;;  %1472 = vmatprep.subr.bf16.mxu0 %v1471_v13  ;;  %v44_v33 = vld [vmem:[%s1934_s0 + $0x38] sm:$0xff] }
   0xc   :  { %1380 = vmatmul.mubr.msk.f32.vlgmr.msra.gmra.mrb[0].mxu1 %vm64_vm0, %v46_v16  ;;  %1368 = vmatmul.mubr.msk.f32.vlgmr.msra.gmra.mrb[0].mxu0 %vm64_vm0, %v38_v17 }
   0xd   :  { %1466 = vmatpush3.bf16.msra.mxu1 %v1463_v12  ;;  %1382 = vmatprep.mubr.msk.f32.mxu1 %vm64_vm0, %v47_v20 }
   0xe   :  { %1468 = vmatprep.subr.bf16.mxu1 %v1467_v21  ;;  %1474 = vmatpush3.bf16.msra.mxu0 %v1471_v13 }
   0xf   :  { %1370 = vmatprep.mubr.msk.f32.mxu0 %vm64_vm0, %v39_v23  ;;  %1476 = vmatprep.subr.bf16.mxu0 %v1475_v22 }
  0x10   :  { %1383 = vmatmul.mubr.msk.f32.gmra.mrb[2].mxu1 %vm64_vm0, %v48_v24  ;;  %1371 = vmatmul.mubr.msk.f32.gmra.mrb[2].mxu0 %vm64_vm0, %v40_v25 }
  0x11   :  { %1385 = vmatprep.mubr.msk.f32.mxu1 %vm64_vm0, %v49_v26  ;;  %1470 = vmatpush3.bf16.msra.mxu1 %v1467_v21 }
  0x12   :  { %1373 = vmatprep.mubr.msk.f32.mxu0 %vm64_vm0, %v41_v27  ;;  %1478 = vmatpush3.bf16.msra.mxu0 %v1475_v22 }
  0x14   :  { %1386 = vmatmul.mubr.msk.f32.gmra.mrb[4].mxu1 %vm64_vm0, %v50_v28  ;;  %1374 = vmatmul.mubr.msk.f32.gmra.mrb[4].mxu0 %vm64_vm0, %v42_v29 }
  0x15   :  { %1388 = vmatprep.mubr.msk.f32.mxu1 %vm64_vm0, %v51_v30  ;;  %1376 = vmatprep.mubr.msk.f32.mxu0 %vm64_vm0, %v43_v31 }
  0x16   :  { %18 = vsyncpa [#allocation5], 0  ;;  %v258_v34 = vld [vmem:[%s1935_s1] sm:$0xff]  ;;  %v259_v36 = vld [vmem:[%s1935_s1 + $0x8] sm:$0xff]  ;;  %v1560_v2 = vmov 0.0|0.0   ;;  %s1561_s5 = smov [#allocation2]  }
  0x17   :  { %v478_v35 = vld [vmem:[%s1936_s2] sm:$0xff]  ;;  %v479_v37 = vld [vmem:[%s1936_s2 + $0x8] sm:$0xff]  ;;  %v260_v38 = vld [vmem:[%s1935_s1 + $0x10] sm:$0xff]  ;;  %v1153_v3 = vcombine.low %v1560_v2, %v1560_v2  ;;  %v1154_v4 = vcombine.high %v1560_v2, %v1560_v2  ;;  %s1026_s29 = sshll.u32 %s1561_s5, 4  ;;  %s1027_s29 = int_to_ptr.vmem [resolvable:$true] %s1026_s29 }
  0x18   :  { %1389 = vmatmul.mubr.msk.f32.gmra.mrb[6].mxu1 %vm64_vm0, %v52_v32  ;;  %1377 = vmatmul.mubr.msk.f32.gmra.mrb[6].mxu0 %vm64_vm0, %v44_v33  ;;  %v480_v39 = vld [vmem:[%s1936_s2 + $0x10] sm:$0xff]  ;;  %v261_v40 = vld [vmem:[%s1935_s1 + $0x18] sm:$0xff]  ;;  %v262_v42 = vld [vmem:[%s1935_s1 + $0x20] sm:$0xff]  ;;  %p1495_p1 = scmp.lt.s32.totalorder %s1027_s29, %s1027_s29 }
  0x19   :  { %1399 = vmatprep.mubr.msk.f32.mxu1 %vm64_vm0, %v258_v34  ;;  %1431 = vmatprep.mubr.msk.f32.mxu0 %vm64_vm0, %v478_v35  ;;  %v481_v41 = vld [vmem:[%s1936_s2 + $0x18] sm:$0xff]  ;;  %v482_v43 = vld [vmem:[%s1936_s2 + $0x20] sm:$0xff]  ;;  %v263_v44 = vld [vmem:[%s1935_s1 + $0x28] sm:$0xff]  ;;  %1007 = vst [vmem:[#allocation6 + $0x8] sm:$0xf] %v1153_v3 }
  0x1a   :  { %v483_v45 = vld [vmem:[%s1936_s2 + $0x28] sm:$0xff]  ;;  %v264_v46 = vld [vmem:[%s1935_s1 + $0x30] sm:$0xff]  ;;  %v265_v48 = vld [vmem:[%s1935_s1 + $0x38] sm:$0xff]  ;;  %1008 = vst [vmem:[#allocation6 + $0xc] sm:$0xf] %v1154_v4 }
  0x1b   :  { %v484_v47 = vld [vmem:[%s1936_s2 + $0x30] sm:$0xff]  ;;  %v485_v49 = vld [vmem:[%s1936_s2 + $0x38] sm:$0xff]  ;;  %v266_v50 = vld [vmem:[%s1935_s1 + $0x40] sm:$0xff]  ;;  %1009 = vst [vmem:[#allocation6 + $0x10] sm:$0xf] %v1153_v3 }
  0x1c   :  { %1400 = vmatmul.mubr.msk.f32.vlgmr.msra.gmra.mrb[8].mxu1 %vm64_vm0, %v259_v36  ;;  %1432 = vmatmul.mubr.msk.f32.vlgmr.msra.gmra.mrb[8].mxu0 %vm64_vm0, %v479_v37  ;;  %v486_v51 = vld [vmem:[%s1936_s2 + $0x40] sm:$0xff]  ;;  %v267_v52 = vld [vmem:[%s1935_s1 + $0x48] sm:$0xff]  ;;  %v268_v54 = vld [vmem:[%s1935_s1 + $0x50] sm:$0xff]  ;;  %1010 = vst [vmem:[#allocation6 + $0x14] sm:$0xf] %v1154_v4 }
  0x1d   :  { %1402 = vmatprep.mubr.msk.f32.mxu1 %vm64_vm0, %v260_v38  ;;  %1434 = vmatprep.mubr.msk.f32.mxu0 %vm64_vm0, %v480_v39  ;;  %v487_v53 = vld [vmem:[%s1936_s2 + $0x48] sm:$0xff]  ;;  %v488_v55 = vld [vmem:[%s1936_s2 + $0x50] sm:$0xff]  ;;  %v269_v56 = vld [vmem:[%s1935_s1 + $0x58] sm:$0xff]  ;;  %1011 = vst [vmem:[#allocation6 + $0x18] sm:$0xf] %v1153_v3 }
  0x1e   :  { %v489_v57 = vld [vmem:[%s1936_s2 + $0x58] sm:$0xff]  ;;  %v270_v58 = vld [vmem:[%s1935_s1 + $0x60] sm:$0xff]  ;;  %v271_v60 = vld [vmem:[%s1935_s1 + $0x68] sm:$0xff]  ;;  %1012 = vst [vmem:[#allocation6 + $0x1c] sm:$0xf] %v1154_v4 }
  0x1f   :  { %v490_v59 = vld [vmem:[%s1936_s2 + $0x60] sm:$0xff]  ;;  %v491_v61 = vld [vmem:[%s1936_s2 + $0x68] sm:$0xff]  ;;  %v272_v62 = vld [vmem:[%s1935_s1 + $0x70] sm:$0xff]  ;;  %1013 = vst [vmem:[#allocation6 + $0x20] sm:$0xf] %v1153_v3 }
  0x20   :  { %1403 = vmatmul.mubr.msk.f32.gmra.mrb[10].mxu1 %vm64_vm0, %v261_v40  ;;  %1435 = vmatmul.mubr.msk.f32.gmra.mrb[10].mxu0 %vm64_vm0, %v481_v41  ;;  %v492_v63 = vld [vmem:[%s1936_s2 + $0x70] sm:$0xff]  ;;  %v273_v0 = vld [vmem:[%s1935_s1 + $0x78] sm:$0xff]  ;;  %1014 = vst [vmem:[#allocation6 + $0x24] sm:$0xf] %v1154_v4  ;;  %1015 = vst [vmem:[#allocation6 + $0x28] sm:$0xf] %v1153_v3 }
  0x21   :  { %1405 = vmatprep.mubr.msk.f32.mxu1 %vm64_vm0, %v262_v42  ;;  %1437 = vmatprep.mubr.msk.f32.mxu0 %vm64_vm0, %v482_v43  ;;  %v493_v1 = vld [vmem:[%s1936_s2 + $0x78] sm:$0xff]  ;;  %1016 = vst [vmem:[#allocation6 + $0x2c] sm:$0xf] %v1154_v4  ;;  %1017 = vst [vmem:[#allocation6 + $0x30] sm:$0xf] %v1153_v3 }
  0x22   :  { %1018 = vst [vmem:[#allocation6 + $0x34] sm:$0xf] %v1154_v4  ;;  %1019 = vst [vmem:[#allocation6 + $0x38] sm:$0xf] %v1153_v3  ;;  %v1068_v5 = vld [vmem:[%s1938_s4] ss:$0 sm:$0xff] }
  0x23   :  { %1020 = vst [vmem:[#allocation6 + $0x3c] sm:$0xf] %v1154_v4 }
  0x24   :  { %1406 = vmatmul.mubr.msk.f32.gmra.mrb[12].mxu1 %vm64_vm0, %v263_v44  ;;  %1438 = vmatmul.mubr.msk.f32.gmra.mrb[12].mxu0 %vm64_vm0, %v483_v45 }
  0x25   :  { %1408 = vmatprep.mubr.msk.f32.mxu1 %vm64_vm0, %v264_v46  ;;  %1440 = vmatprep.mubr.msk.f32.mxu0 %vm64_vm0, %v484_v47 }
  0x28   :  { %1409 = vmatmul.mubr.msk.f32.gmra.mrb[14].mxu1 %vm64_vm0, %v265_v48  ;;  %1441 = vmatmul.mubr.msk.f32.gmra.mrb[14].mxu0 %vm64_vm0, %v485_v49 }
  0x29   :  { %1411 = vmatprep.mubr.msk.f32.mxu1 %vm64_vm0, %v266_v50  ;;  %1443 = vmatprep.mubr.msk.f32.mxu0 %vm64_vm0, %v486_v51 }
  0x2c   :  { %1412 = vmatmul.mubr.msk.f32.gmra.mrb[16].mxu1 %vm64_vm0, %v267_v52  ;;  %1444 = vmatmul.mubr.msk.f32.gmra.mrb[16].mxu0 %vm64_vm0, %v487_v53 }
  0x2d   :  { %1414 = vmatprep.mubr.msk.f32.mxu1 %vm64_vm0, %v268_v54  ;;  %1446 = vmatprep.mubr.msk.f32.mxu0 %vm64_vm0, %v488_v55  ;;  %v1861_v55 = vld [vmem:[%s1940_s6] ss:$0 sm:$0xff]  ;;  %s1490_s6 = scalar_lea.vmem %s1027_s29, 1024 }
  0x2e   :  { %p1491_p0 = scmp.ne.s32.totalorder %s1027_s29, %s1490_s6  ;;  %p1496_p2 = scmp.lt.s32.totalorder %s1490_s6, %s1490_s6 }
  0x30   :  { %1415 = vmatmul.mubr.msk.f32.gmra.mrb[18].mxu1 %vm64_vm0, %v269_v56  ;;  %1447 = vmatmul.mubr.msk.f32.gmra.mrb[18].mxu0 %vm64_vm0, %v489_v57  ;;  %p1497_p3 = por %p1496_p2, %p1495_p1 }
  0x31   :  { %1417 = vmatprep.mubr.msk.f32.mxu1 %vm64_vm0, %v270_v58  ;;  %1449 = vmatprep.mubr.msk.f32.mxu0 %vm64_vm0, %v490_v59  ;;  %v1102_v59 = vld [vmem:[%s1942_s8] ss:$0 sm:$0xff] }
  0x32   :  { %p1498_p4 = pnand %p1497_p3, %p1491_p0 }
  0x34   :  { %1418 = vmatmul.mubr.msk.f32.gmra.mrb[20].mxu1 %vm64_vm0, %v271_v60  ;;  %1450 = vmatmul.mubr.msk.f32.gmra.mrb[20].mxu0 %vm64_vm0, %v491_v61 }
  0x35   :  { %1420 = vmatprep.mubr.msk.f32.mxu1 %vm64_vm0, %v272_v62  ;;  %1452 = vmatprep.mubr.msk.f32.mxu0 %vm64_vm0, %v492_v63 }
  0x38   :  { %1421 = vmatmul.mubr.msk.f32.gmra.mrb[22].mxu1 %vm64_vm0, %v273_v0  ;;  %1453 = vmatmul.mubr.msk.f32.gmra.mrb[22].mxu0 %vm64_vm0, %v493_v1 }
  0xdf   :  { %v1381_v6 = vpop.f32.mrb[0].mxu1  ;;  %v1369_v7 = vpop.f32.mrb[0].mxu0 }
  0xe0   :  { %v225_v8 = vadd.f32 %v1381_v6, %v1068_v5  ;;  %v219_v9 = vpop.f32.mrb[1].mxu1  ;;  %v185_v10 = vadd.f32 %v1369_v7, %v1068_v5  ;;  %v179_v11 = vpop.f32.mrb[1].mxu0 }
  0xe1   :  { %v220_v12 = vadd.f32 %v1068_v5, %v219_v9  ;;  %v180_v13 = vadd.f32 %v1068_v5, %v179_v11  ;;  %v1562_v9 = vmov 0.0  }
  0xe2   :  { %v707_v14 = vmul.f32 0.25, %v225_v8  ;;  %v699_v15 = vmul.f32 0.25, %v185_v10 }
  0xe3   :  { %v706_v16 = vmul.f32 0.25, %v220_v12  ;;  %v1384_v17 = vpop.f32.mrb[2].mxu1  ;;  %v698_v18 = vmul.f32 0.25, %v180_v13  ;;  %v1372_v19 = vpop.f32.mrb[2].mxu0 }
  0xe4   :  { %v235_v20 = vadd.f32 %v1384_v17, %v1068_v5  ;;  %v229_v21 = vpop.f32.mrb[3].mxu1  ;;  %v195_v22 = vadd.f32 %v1372_v19, %v1068_v5  ;;  %v189_v23 = vpop.f32.mrb[3].mxu0 }
  0xe5   :  { %v1224_v24 = vpack.c.bf16 %v707_v14, %v706_v16  ;;  %v230_v25 = vadd.f32 %v1068_v5, %v229_v21  ;;  %v1204_v26 = vpack.c.bf16 %v699_v15, %v698_v18  ;;  %v190_v27 = vadd.f32 %v1068_v5, %v189_v23 }
  0xe6   :  { %v709_v28 = vmul.f32 0.25, %v235_v20  ;;  %v701_v29 = vmul.f32 0.25, %v195_v22 }
  0xe7   :  { %1288 = vst [vmem:[#allocation2 + $0x20] sm:$0xff] %v1224_v24   ;;  %v708_v30 = vmul.f32 0.25, %v230_v25  ;;  %1205 = vst [vmem:[#allocation2] sm:$0xff] %v1204_v26   ;;  %v1387_v31 = vpop.f32.mrb[4].mxu1  ;;  %v700_v32 = vmul.f32 0.25, %v190_v27  ;;  %v1375_v33 = vpop.f32.mrb[4].mxu0 }
  0xe8   :  { %v245_v34 = vadd.f32 %v1387_v31, %v1068_v5  ;;  %v239_v35 = vpop.f32.mrb[5].mxu1  ;;  %v205_v36 = vadd.f32 %v1375_v33, %v1068_v5  ;;  %v199_v37 = vpop.f32.mrb[5].mxu0 }
  0xe9   :  { %v1229_v38 = vpack.c.bf16 %v709_v28, %v708_v30  ;;  %v240_v39 = vadd.f32 %v1068_v5, %v239_v35  ;;  %v1209_v40 = vpack.c.bf16 %v701_v29, %v700_v32  ;;  %v200_v41 = vadd.f32 %v1068_v5, %v199_v37 }
  0xea   :  { %v711_v42 = vmul.f32 0.25, %v245_v34  ;;  %v703_v43 = vmul.f32 0.25, %v205_v36 }
  0xeb   :  { %1289 = vst [vmem:[#allocation2 + $0x28] sm:$0xff] %v1229_v38   ;;  %v710_v44 = vmul.f32 0.25, %v240_v39  ;;  %1285 = vst [vmem:[#allocation2 + $0x8] sm:$0xff] %v1209_v40   ;;  %v1390_v45 = vpop.f32.mrb[6].mxu1  ;;  %v702_v46 = vmul.f32 0.25, %v200_v41  ;;  %v1378_v47 = vpop.f32.mrb[6].mxu0 }
  0xec   :  { %v255_v48 = vadd.f32 %v1390_v45, %v1068_v5  ;;  %v249_v49 = vpop.f32.mrb[7].mxu1  ;;  %v215_v50 = vadd.f32 %v1378_v47, %v1068_v5  ;;  %v209_v51 = vpop.f32.mrb[7].mxu0 }
  0xed   :  { %v1234_v52 = vpack.c.bf16 %v711_v42, %v710_v44  ;;  %v250_v53 = vadd.f32 %v1068_v5, %v249_v49  ;;  %v1214_v54 = vpack.c.bf16 %v703_v43, %v702_v46  ;;  %v210_v56 = vadd.f32 %v1068_v5, %v209_v51 }
  0xee   :  { %v713_v57 = vmul.f32 0.25, %v255_v48  ;;  %v705_v58 = vmul.f32 0.25, %v215_v50 }
  0xef   :  { %1290 = vst [vmem:[#allocation2 + $0x30] sm:$0xff] %v1234_v52   ;;  %v712_v60 = vmul.f32 0.25, %v250_v53  ;;  %1286 = vst [vmem:[#allocation2 + $0x10] sm:$0xff] %v1214_v54   ;;  %v1401_v61 = vpop.f32.mrb[8].mxu1  ;;  %v704_v62 = vmul.f32 0.25, %v210_v56  ;;  %v1433_v63 = vpop.f32.mrb[8].mxu0 }
  0xf0   :  { %v405_v0 = vadd.f32 %v1401_v61, %v1861_v55  ;;  %v399_v1 = vpop.f32.mrb[9].mxu1  ;;  %v619_v2 = vpop.f32.mrb[9].mxu0 }
  0xf1   :  { %v1239_v3 = vpack.c.bf16 %v713_v57, %v712_v60  ;;  %v400_v4 = vadd.f32 %v1861_v55, %v399_v1  ;;  %v1219_v5 = vpack.c.bf16 %v705_v58, %v704_v62  ;;  %v620_v6 = vadd.f32 %v1102_v59, %v619_v2 }
  0xf3   :  { %1291 = vst [vmem:[#allocation2 + $0x38] sm:$0xff] %v1239_v3   ;;  %v1244_v7 = vpack.c.bf16 %v405_v0, %v400_v4  ;;  %1287 = vst [vmem:[#allocation2 + $0x18] sm:$0xff] %v1219_v5   ;;  %v1404_v8 = vpop.f32.mrb[10].mxu1  ;;  %v1283_v10 = vpack.c.bf16 %v1562_v9, %v620_v6  ;;  %v1436_v11 = vpop.f32.mrb[10].mxu0 }
  0xf4   :  { %v415_v12 = vadd.f32 %v1404_v8, %v1861_v55  ;;  %v409_v13 = vpop.f32.mrb[11].mxu1  ;;  %v629_v14 = vpop.f32.mrb[11].mxu0 }
  0xf5   :  { %1501 = shalt.err (!%p1498_p4)
}
  0xf6   :  { %s1502_s12 = scalar_lea.hbm %s1943_s9, 1024 }
  0xf7   :  { %p1503_p5 = scmp.ne.s32.totalorder %s1943_s9, %s1502_s12  ;;  %p1506_p6 = scmp.lt.u32.totalorder %s1502_s12, %s1943_s9 }
  0xf9   :  { %p1508_p7 = pnand %p1506_p6, %p1503_p5 }
  0xfb   :  { %1511 = shalt.err (!%p1508_p7)
}
  0xfc   :  { %s1563_s0 = smov 64   ;;  %s1564_s15 = smov 4   ;;  %1245 = vst [vmem:[#allocation4] sm:$0xff] %v1244_v7   ;;  %v410_v15 = vadd.f32 %v1861_v55, %v409_v13  ;;  %1284 = vst [vmem:[#allocation6] sm:$0xff] %v1283_v10   ;;  %v1407_v17 = vpop.f32.mrb[12].mxu1  ;;  %v1439_v18 = vpop.f32.mrb[12].mxu0 }
  0xfd   :  { %1032 = dma.vmem_to_hbm [thread:$0]  %s1027_s29, 1024, %s1943_s9, [#allocation3], %s1563_s0, %s1563_s0, %s1564_s15   ;;  %v425_v19 = vadd.f32 %v1407_v17, %v1861_v55  ;;  %v419_v20 = vpop.f32.mrb[13].mxu1  ;;  %v639_v21 = vpop.f32.mrb[13].mxu0 }
  0xfe   :  { %v1249_v16 = vpack.c.bf16 %v415_v12, %v410_v15  ;;  %v420_v22 = vadd.f32 %v1861_v55, %v419_v20  ;;  %v1410_v24 = vpop.f32.mrb[14].mxu1  ;;  %v1442_v25 = vpop.f32.mrb[14].mxu0  ;;  %s1565_s9 = smov [#allocation4]   ;;  %s1566_s19 = smov [#allocation6]  }
  0xff   :  { %v435_v26 = vadd.f32 %v1410_v24, %v1861_v55  ;;  %v429_v27 = vpop.f32.mrb[15].mxu1  ;;  %v649_v28 = vpop.f32.mrb[15].mxu0  ;;  %s1038_s18 = sshll.u32 %s1565_s9, 4  ;;  %s1050_s20 = sshll.u32 %s1566_s19, 4  ;;  %s1039_s18 = int_to_ptr.vmem [resolvable:$true] %s1038_s18  ;;  %s1897_s20 = int_to_ptr.vmem [resolvable:$true] %s1050_s20 }
 0x100   :  { %1292 = vst [vmem:[#allocation4 + $0x8] sm:$0xff] %v1249_v16   ;;  %v1254_v23 = vpack.c.bf16 %v425_v19, %v420_v22  ;;  %v430_v29 = vadd.f32 %v1861_v55, %v429_v27  ;;  %v1413_v31 = vpop.f32.mrb[16].mxu1  ;;  %v1445_v32 = vpop.f32.mrb[16].mxu0  ;;  %s1512_s21 = scalar_lea.vmem %s1039_s18, 1024  ;;  %p1517_p9 = scmp.lt.s32.totalorder %s1039_s18, %s1039_s18 }
 0x101   :  { %v445_v33 = vadd.f32 %v1413_v31, %v1861_v55  ;;  %v439_v34 = vpop.f32.mrb[17].mxu1  ;;  %v659_v35 = vpop.f32.mrb[17].mxu0  ;;  %p1513_p8 = scmp.ne.s32.totalorder %s1039_s18, %s1512_s21  ;;  %p1518_p10 = scmp.lt.s32.totalorder %s1512_s21, %s1512_s21 }
 0x102   :  { %1293 = vst [vmem:[#allocation4 + $0x10] sm:$0xff] %v1254_v23   ;;  %v1259_v30 = vpack.c.bf16 %v435_v26, %v430_v29  ;;  %v440_v36 = vadd.f32 %v1861_v55, %v439_v34 }
 0x103   :  { %v1416_v38 = vpop.f32.mrb[18].mxu1  ;;  %v1448_v39 = vpop.f32.mrb[18].mxu0  ;;  %p1519_p11 = por %p1518_p10, %p1517_p9 }
 0x104   :  { %1294 = vst [vmem:[#allocation4 + $0x18] sm:$0xff] %v1259_v30   ;;  %v1264_v37 = vpack.c.bf16 %v445_v33, %v440_v36  ;;  %v455_v40 = vadd.f32 %v1416_v38, %v1861_v55  ;;  %v449_v41 = vpop.f32.mrb[19].mxu1  ;;  %v669_v42 = vpop.f32.mrb[19].mxu0 }
 0x105   :  { %v450_v43 = vadd.f32 %v1861_v55, %v449_v41  ;;  %p1520_p12 = pnand %p1519_p11, %p1513_p8 }
 0x106   :  { %1295 = vst [vmem:[#allocation4 + $0x20] sm:$0xff] %v1264_v37  }
 0x107   :  { %v1269_v44 = vpack.c.bf16 %v455_v40, %v450_v43  ;;  %v1419_v45 = vpop.f32.mrb[20].mxu1  ;;  %v1451_v46 = vpop.f32.mrb[20].mxu0 }
 0x108   :  { %v465_v47 = vadd.f32 %v1419_v45, %v1861_v55  ;;  %v459_v48 = vpop.f32.mrb[21].mxu1  ;;  %v679_v49 = vpop.f32.mrb[21].mxu0 }
 0x109   :  { %1296 = vst [vmem:[#allocation4 + $0x28] sm:$0xff] %v1269_v44   ;;  %v460_v50 = vadd.f32 %v1861_v55, %v459_v48 }
 0x10b   :  { %v1274_v51 = vpack.c.bf16 %v465_v47, %v460_v50  ;;  %v1422_v52 = vpop.f32.mrb[22].mxu1  ;;  %v1454_v53 = vpop.f32.mrb[22].mxu0 }
 0x10c   :  { %v475_v54 = vadd.f32 %v1422_v52, %v1861_v55  ;;  %v469_v56 = vpop.f32.mrb[23].mxu1  ;;  %v689_v57 = vpop.f32.mrb[23].mxu0 }
 0x10d   :  { %1297 = vst [vmem:[#allocation4 + $0x30] sm:$0xff] %v1274_v51   ;;  %v470_v58 = vadd.f32 %v1861_v55, %v469_v56 }
 0x10f   :  { %v1279_v59 = vpack.c.bf16 %v475_v54, %v470_v58 }
 0x111   :  { %1298 = vst [vmem:[#allocation4 + $0x38] sm:$0xff] %v1279_v59  }
 0x112   :  { %1523 = shalt.err (!%p1520_p12)
}
 0x113   :  { %s1524_s24 = scalar_lea.hbm %s1944_s10, 1024 }
 0x114   :  { %p1525_p13 = scmp.ne.s32.totalorder %s1944_s10, %s1524_s24  ;;  %p1528_p0 = scmp.lt.u32.totalorder %s1524_s24, %s1944_s10 }
 0x116   :  { %p1530_p1 = pnand %p1528_p0, %p1525_p13 }
 0x118   :  { %1533 = shalt.err (!%p1530_p1)
}
 0x119   :  { %1044 = dma.vmem_to_hbm [thread:$0]  %s1039_s18, 1024, %s1944_s10, [#allocation5], %s1563_s0, %s1563_s0, %s1564_s15  }
 0x11a   :  { %s1534_s28 = scalar_lea.vmem %s1897_s20, 1024  ;;  %p1539_p3 = scmp.lt.s32.totalorder %s1897_s20, %s1897_s20 }
 0x11b   :  { %p1535_p2 = scmp.ne.s32.totalorder %s1897_s20, %s1534_s28  ;;  %p1540_p4 = scmp.lt.s32.totalorder %s1534_s28, %s1534_s28 }
 0x11d   :  { %p1541_p5 = por %p1540_p4, %p1539_p3 }
 0x11f   :  { %p1542_p6 = pnand %p1541_p5, %p1535_p2 }
 0x121   :  { %1545 = shalt.err (!%p1542_p6)
}
 0x122   :  { %s1546_s6 = scalar_lea.hbm %s1945_s11, 1024 }
 0x123   :  { %p1547_p7 = scmp.ne.s32.totalorder %s1945_s11, %s1546_s6  ;;  %p1550_p8 = scmp.lt.u32.totalorder %s1546_s6, %s1945_s11 }
 0x125   :  { %p1552_p9 = pnand %p1550_p8, %p1547_p7 }
 0x127   :  { %1555 = shalt.err (!%p1552_p9)
}
 0x128   :  { %1056 = dma.vmem_to_hbm [thread:$0]  %s1897_s20, 1024, %s1945_s11, [#allocation5], %s1563_s0, %s1563_s0, %s1564_s15  }
 0x129   :  { %1556 = dma.done.wait [#allocation3], 1024  }
 0x12a   :  { %1557 = vsyncadd [#allocation3], 4294966272 }
 0x12b   :  { %1558 = dma.done.wait [#allocation5], 2048  }
 0x12c   :  { %1559 = vsyncadd [#allocation5], 4294965248 }
 0x12d   :  { %1066 = vsyncpa [#allocation3], 1 }
 0x12e   :  { %1067 = vsyncpa [#allocation5], 1 }

</bundles_post_ra>
